<compile_context>
chip_gen: v6e
topology: v6e:2x2x1
jax: 0.10.0
libtpu: 0.0.40
codegen_flags: <defaults>
</compile_context>

<pallas_src>
import jax
import jax.numpy as jnp
from jax.experimental import pallas as pl
from jax.experimental.pallas import tpu as pltpu


def _residual_conv1x1_kernel(w_ref, b_ref, x_ref, o_ref):
    # w_ref: (Cout, Cin)  grid-resident
    # b_ref: (Cout, 1)    grid-resident (broadcasts over the lane axis)
    # x_ref, o_ref: (1, C, TS) -- spatial on lanes (dense loads/stores)
    x = x_ref[0]                                   # (C, TS)
    # 1x1 conv over channels == (Cout, Cin) @ (Cin, TS); fp32 accumulation.
    acc = jnp.dot(w_ref[...], x, preferred_element_type=jnp.float32)
    acc = acc + b_ref[...].astype(jnp.float32)     # bias, broadcast over lanes
    acc = acc + x.astype(jnp.float32)              # identity shortcut
    o_ref[0] = acc.astype(o_ref.dtype)


def residual_conv1x1(x_nchw: jax.Array, weight: jax.Array, bias: jax.Array,
                     *, ts_max: int = 2048) -> jax.Array:
    """forward(x) = Conv2d(C, C, 1)(x) + x, x in NCHW (no layout round-trips)."""
    n, c, h, w = x_nchw.shape
    c_out, c_in = weight.shape
    assert c_in == c and c_out == c, "identity shortcut requires Cout == Cin == C"

    hw = h * w
    x3d = x_nchw.reshape(n, c, hw)     # free view: spatial axis -> lanes
    b2d = bias.reshape(c, 1)

    # Spatial tile: lane-dense multiple of 128 when possible, else full extent
    # (block shape must be divisible by (8,128) or equal the full array dims).
    if hw % 128 == 0:
        ts = min(hw, ts_max)
    else:
        ts = hw
    grid = (n, pl.cdiv(hw, ts))

    itemsize = jnp.dtype(x_nchw.dtype).itemsize

    out3d = pl.pallas_call(
        _residual_conv1x1_kernel,
        out_shape=jax.ShapeDtypeStruct((n, c, hw), x_nchw.dtype),
        grid_spec=pltpu.PrefetchScalarGridSpec(
            num_scalar_prefetch=0,
            grid=grid,
            in_specs=[
                pl.BlockSpec((c, c), lambda i, j: (0, 0)),        # weight (resident)
                pl.BlockSpec((c, 1), lambda i, j: (0, 0)),        # bias   (resident)
                pl.BlockSpec((1, c, ts), lambda i, j: (i, 0, j)),  # x tile
            ],
            out_specs=pl.BlockSpec((1, c, ts), lambda i, j: (i, 0, j)),
        ),
        compiler_params=pltpu.CompilerParams(
            dimension_semantics=("parallel", "parallel"),
        ),
        cost_estimate=pl.CostEstimate(
            flops=2 * n * hw * c * c,
            transcendentals=0,
            bytes_accessed=2 * n * c * hw * itemsize + (c * c + c) * itemsize,
        ),
    )(weight, b2d, x3d)

    return out3d.reshape(n, c, h, w)


if __name__ == "__main__":
    key = jax.random.PRNGKey(0)
    kx, kw, kb = jax.random.split(key, 3)

    N, C, H, W = 2, 4, 16, 16
    x = jax.random.normal(kx, (N, C, H, W), dtype=jnp.float32)
    # deterministic parameters (mirrors Conv2d(C, C, 1) parameter shapes)
    weight = jax.random.normal(kw, (C, C), dtype=jnp.float32) * 0.1   # (Cout, Cin)
    bias = jax.random.normal(kb, (C,), dtype=jnp.float32) * 0.1

    out = residual_conv1x1(x, weight, bias)
    out = jax.block_until_ready(out)

    # plain-JAX reference of the same forward: conv1x1(x) + bias + x
    ref = jnp.einsum("oc,nchw->nohw", weight, x) + bias[None, :, None, None] + x
    assert out.shape == (N, C, H, W)
    assert jnp.allclose(out, ref, atol=1e-5, rtol=1e-5)

    print("KERNEL_OK")
</pallas_src>

<mosaic_0001>
module attributes {stable_mosaic.version = 11 : i64} {
  func.func @_residual_conv1x1_kernel(%arg0: i32, %arg1: i32, %arg2: memref<4x4xf32, #tpu.memory_space<vmem>>, %arg3: memref<4x1xf32, #tpu.memory_space<vmem>>, %arg4: memref<1x4x256xf32, #tpu.memory_space<vmem>>, %arg5: memref<1x4x256xf32, #tpu.memory_space<vmem>>) attributes {dimension_semantics = [#tpu.dimension_semantics<parallel>, #tpu.dimension_semantics<parallel>], iteration_bounds = array<i64: 2, 1>, scalar_prefetch = 0 : i64, scratch_operands = 0 : i64, tpu.core_type = #tpu.core_type<tc>, window_params = [{pipeline_mode = #tpu.pipeline_mode<synchronous>, transform_indices = @transform_0, window_bounds = array<i64: 4, 4>}, {pipeline_mode = #tpu.pipeline_mode<synchronous>, transform_indices = @transform_1, window_bounds = array<i64: 4, 1>}, {transform_indices = @transform_2, window_bounds = array<i64: 1, 4, 256>}, {transform_indices = @transform_3, window_bounds = array<i64: 1, 4, 256>}]} {
    %c0 = arith.constant 0 : index
    %c0_0 = arith.constant 0 : index
    %c0_1 = arith.constant 0 : index
    %0 = vector.load %arg4[%c0, %c0_0, %c0_1] : memref<1x4x256xf32, #tpu.memory_space<vmem>>, vector<1x4x256xf32>
    %1 = vector.shape_cast %0 : vector<1x4x256xf32> to vector<4x256xf32>
    %c0_2 = arith.constant 0 : index
    %c0_3 = arith.constant 0 : index
    %2 = vector.load %arg2[%c0_2, %c0_3] : memref<4x4xf32, #tpu.memory_space<vmem>>, vector<4x4xf32>
    %cst = arith.constant dense<0.000000e+00> : vector<4x256xf32>
    %3 = tpu.matmul %2, %1, %cst {dimension_numbers = #tpu.dot_dimension_numbers<[1], [0], [0], [1], [0, 0, 1, 1], [], []>} : vector<4x4xf32>, vector<4x256xf32>, vector<4x256xf32> -> vector<4x256xf32>
    %c0_4 = arith.constant 0 : index
    %c0_5 = arith.constant 0 : index
    %4 = vector.load %arg3[%c0_4, %c0_5] : memref<4x1xf32, #tpu.memory_space<vmem>>, vector<4x1xf32>
    %5 = vector.broadcast %4 : vector<4x1xf32> to vector<4x256xf32>
    %6 = arith.addf %3, %5 : vector<4x256xf32>
    %7 = arith.addf %6, %1 : vector<4x256xf32>
    %c0_6 = arith.constant 0 : index
    %c0_7 = arith.constant 0 : index
    %c0_8 = arith.constant 0 : index
    %8 = vector.load %arg5[%c0_6, %c0_7, %c0_8] : memref<1x4x256xf32, #tpu.memory_space<vmem>>, vector<1x4x256xf32>
    %9 = vector.shape_cast %8 : vector<1x4x256xf32> to vector<4x256xf32>
    %10 = vector.shape_cast %7 : vector<4x256xf32> to vector<1x4x256xf32>
    tpu.vector_store %arg5[%c0_6, %c0_7, %c0_8], %10 {strides = array<i32>} : memref<1x4x256xf32, #tpu.memory_space<vmem>>, vector<1x4x256xf32>,
    return
  }
  func.func @transform_0(%arg0: i32, %arg1: i32) -> (i32, i32) {
    %c0_i32 = arith.constant 0 : i32
    %c0_i32_0 = arith.constant 0 : i32
    %c0_i32_1 = arith.constant 0 : i32
    return %c0_i32, %c0_i32_0 : i32, i32
  }
  func.func @transform_1(%arg0: i32, %arg1: i32) -> (i32, i32) {
    %c0_i32 = arith.constant 0 : i32
    %c0_i32_0 = arith.constant 0 : i32
    %c0_i32_1 = arith.constant 0 : i32
    return %c0_i32, %c0_i32_0 : i32, i32
  }
  func.func @transform_2(%arg0: i32, %arg1: i32) -> (i32, i32, i32) {
    %c0_i32 = arith.constant 0 : i32
    %c0_i32_0 = arith.constant 0 : i32
    return %arg0, %c0_i32, %arg1 : i32, i32, i32
  }
  func.func @transform_3(%arg0: i32, %arg1: i32) -> (i32, i32, i32) {
    %c0_i32 = arith.constant 0 : i32
    %c0_i32_0 = arith.constant 0 : i32
    return %arg0, %c0_i32, %arg1 : i32, i32, i32
  }
}

</mosaic_0001>

<bundles_post_ra>
// kernel: tpu_custom_call.1
= control target key start
LH: loop header
LB: loop body
LE: loop exit
PB: predicated region body
PF: predicated region fallthrough
CT: control target
= control target key end

     0   :  { %8 = vsyncpa [#allocation3], 0  ;;  %s766_s0 = inlined_call_operand.vmem [shape: f32[4,4], index: 0, kind: input, shape index: {}]   ;;  %s767_s1 = inlined_call_operand.vmem [shape: f32[4,1], index: 1, kind: input, shape index: {}]   ;;  %s768_s2 = inlined_call_operand.hbm [shape: f32[2,4,256], index: 2, kind: input, shape index: {}]   ;;  %s769_s3 = inlined_call_operand.hbm [shape: f32[2,4,256], index: 3, kind: output, shape index: {}]  }
   0x1   :  { %10 = vsyncpa [#allocation3 + $0x1], 0 }
   0x2   :  { %11 = vsyncpa [#allocation4], 0 }
   0x3   :  { %13 = vsyncpa [#allocation4 + $0x1], 0  ;;  %s626_s12 = smov 0   ;;  %s628_s13 = smov 0  }
   0x4   :  { %s630_s14 = smov 0   ;;  %s632_s15 = smov 0  }
   0x5   :  { %s634_s16 = smov 0   ;;  %s636_s17 = smov 0  }
   0x6 LB: > { %s406_s18 = sadd.s32 4294967295, %s600_s17   ;;  %s407_s19 = sadd.s32 4294967294, %s600_s17   ;;  %s600_s17 = sphi %s636_s17, %s19_s17   ;;  %s596_s16 = sphi %s634_s16, %s781_s16   ;;  %s592_s15 = sphi %s632_s15, %s780_s15   ;;  %s588_s14 = sphi %s630_s14, %s779_s14   ;;  %s584_s13 = sphi %s628_s13, %s778_s13   ;;  %s580_s12 = sphi %s626_s12, %s777_s12  }
   0x7   : > { %s31_s20 = sadd.s32 1, %s596_s16  ;;  %s82_s21 = sadd.s32 1, %s588_s14 }
   0x8   : > { %p33_p0 = scmp.ge.s32.totalorder %s31_s20, 2  ;;  %p89_p1 = scmp.ne.s32.totalorder %s588_s14, %s584_s13 }
   0x9   : > { %p90_p2 = scmp.eq.s32.totalorder %s600_s17, 0  ;;  %p95_p3 = scmp.ne.s32.totalorder %s584_s13, %s580_s12 }
   0xa   : > { %s783_s20 = smov (%p33_p0, %s31_s20), 0  ;;  %p96_p5 = scmp.eq.s32.totalorder %s406_s18, 0 }
   0xb   : > { %p667_p4 = por %p90_p2, %p89_p1  ;;  %s77_s23 = ssub.s32 %s596_s16, %s783_s20 }
   0xc   : > { %p121_p6 = scmp.eq.s32.totalorder %s406_s18, 1  ;;  %p80_p7 = scmp.eq.s32.totalorder %s77_s23, 0 }
   0xd   : > { %p673_p8 = por %p96_p5, %p95_p3  ;;  %p127_p10 = scmp.eq.s32.totalorder %s407_s19, 1 }
   0xe   : > { %p677_p9 = por %p121_p6, %p89_p1  ;;  %p438_p13 = scmp.lt.s32.totalorder %s600_s17, 2 }
   0xf   : > { %s682_s26 = scalar_select %p80_p7, %s588_s14, %s82_s21  }
  0x10   : > { %p684_p11 = por %p127_p10, %p95_p3  ;;  %s153_s28 = sand.u32 1, %s588_s14  }
  0x11   : > { %s410_s29 = sshll.u32 %s153_s28, 3  ;;  %s424_s30 = sshll.u32 %s596_s16, 7 }
  0x12   : > { %s773_s27 = scalar_select %p684_p11, 1, 0 }
  0x13   : > { %s165_s6 = scalar_lea.hbm %s768_s2, %s424_s30  ;;  %s157_s7 = scalar_lea.vmem [#allocation2], %s410_s29 }
  0x14   : > { %s167_s8 = sshll.u32 %s157_s7, 4  ;;  %p697_p0 = pnand %p438_p13, %p667_p4  ;;  %s168_s8 = int_to_ptr.vmem [resolvable:$true] %s167_s8 }
  0x15   : > { %p413_p1 = scmp.ge.s32.totalorder %s600_s17, 1  ;;  %p172_p2 = scmp.lt.s32.totalorder %s600_s17, 3 }
  0x16   : > { %s154_s10 = scalar_lea.sflag [#allocation3], %s153_s28  ;;  %p494_p3 = pneg %p697_p0 }
  0x17   : > { %s505_s11 = scalar_lea.vmem %s168_s8, 128  ;;  %s602_s18 = smov [#allocation2]  }
  0x18   : > { %p506_p5 = scmp.ne.s32.totalorder %s168_s8, %s505_s11  ;;  %s510_s19 = sshll.u32 %s602_s18, 4  ;;  %s511_s19 = int_to_ptr.vmem [resolvable:$false] %s510_s19 }
  0x19   : > { %s512_s21 = scalar_lea.vmem %s511_s19, 256  ;;  %p513_p10 = scmp.lt.s32.totalorder %s168_s8, %s511_s19 }
  0x1a   : > { %p508_p6 = pnand %p506_p5, %p494_p3  ;;  %p514_p12 = scmp.lt.s32.totalorder %s512_s21, %s505_s11 }
  0x1c   : > { %p509_p7 = pneg %p508_p6  ;;  %p515_p4 = por %p514_p12, %p513_p10 }
  0x1e   : > { %p516_p13 = pnand %p515_p4, %p509_p7 }
  0x20   : > { %519 = shalt.err (!%p516_p13)
}
  0x21   : > { %433 = dma.hbm_to_vmem [thread:$0]  (!%p697_p0), %s165_s6, 128, %s168_s8, %s154_s10  }
  0x22   : > { %p173_p11 = pnand %p413_p1, %p172_p2 }
  0x23   : > { %s712_s22 = sand.u32 (!%p173_p11), 1, %s584_s13  }
  0x24   : > { %176 = sbr.rel (%p173_p11) target bundleno = 261 (0x105), region = 32  ;;  %s414_s23 = sshll.u32 (!%p173_p11), %s712_s22, 3 }
  0x25   : > { %s179_s28 = scalar_lea.sflag (!%p173_p11), [#allocation3], %s712_s22  ;;  %s182_s29 = scalar_lea.vmem (!%p173_p11), [#allocation2], %s414_s23 }
  0x29   : > { %571 = dma.done.wait (%p673_p8), %s179_s28, 128  }
  0x2a   : > { %573 = vsyncadd (%p673_p8), %s179_s28, 4294967168  ;;  %v603_v0 = vmov 0.0   ;;  %v604_v1 = vmov 0   ;;  %v207_v2 = vld [vmem:[%s182_s29] sm:$0xff]  ;;  %vm221_vm0 = vcmask 1043456   ;;  %vm217_vm1 = vcmask 31744  }
  0x2b   : > { %290 = vmatprep.mubr.f32.mxu0 %v603_v0  ;;  %490 = vset.pattern.permute.xlu0 %v604_v1  ;;  %v209_v3 = vld [vmem:[%s767_s1] sm:$0xf]  ;;  %v216_v4 = vcombine.high %v207_v2, %v207_v2  ;;  %s425_s24 = sshll.u32 %s592_s15, 7  ;;  %s204_s7 = scalar_lea.vmem [#allocation5], %s414_s23 }
  0x2c   : > { %212 = vperm.xlu0 %490, %v209_v3   ;;  %v208_v5 = vld [vmem:[%s766_s0] sm:$0xf]  ;;  %s322_s8 = sshll.u32 %s204_s7, 4  ;;  %s320_s11 = scalar_lea.hbm %s769_s3, %s425_s24  ;;  %s323_s8 = int_to_ptr.vmem [resolvable:$true] %s322_s8 }
  0x2d   : > { %416 = vmatprep.subr.msk.mxu0 %vm221_vm0, %v216_v4  ;;  %s306_s18 = scalar_lea.sflag [#allocation4], %s712_s22  ;;  %s520_s19 = scalar_lea.vmem %s323_s8, 128 }
  0x2e   : > { %417 = vmatpush1.msk.msra.mxu0 %vm221_vm0, %v207_v2  ;;  %p521_p8 = scmp.ne.s32.totalorder %s323_s8, %s520_s19  ;;  %s605_s21 = smov [#allocation5]  }
  0x2f   : > { %418 = vmatmul.mubr.msk.f32.vlgmr.msra.gmra.mxu0 %vm217_vm1, %v208_v5  ;;  %s524_s28 = sshll.u32 %s605_s21, 4  ;;  %s525_s28 = int_to_ptr.vmem [resolvable:$false] %s524_s28 }
  0x30   : > { %p522_p11 = pnand %p521_p8, %p677_p9  ;;  %s526_s15 = scalar_lea.vmem %s525_s28, 256 }
  0x31   : > { %p527_p0 = scmp.lt.s32.totalorder %s323_s8, %s525_s28  ;;  %p528_p1 = scmp.lt.s32.totalorder %s526_s15, %s520_s19 }
  0x32   : > { %p523_p12 = pneg %p522_p11 }
  0x33   : > { %p529_p2 = por %p528_p1, %p527_p0 }
  0x35   : > { %p530_p3 = pnand %p529_p2, %p523_p12 }
  0xa7   : > { %v213_v6 = vpop.permute.xlu0 %212 }
  0xef   : > { %v292_v7 = vpop.f32.mrf.mxu0 }
  0xf0   : > { %v293_v8 = vadd.f32 %v292_v7, %v213_v6 }
  0xf1   : > { %v294_v9 = vpop.f32.mrf.mxu0 }
  0xf2   : > { %v295_v10 = vadd.f32 %v294_v9, %v213_v6  ;;  %v298_v11 = vadd.f32 %v293_v8, %v207_v2 }
  0xf4   : > { %v299_v12 = vadd.f32 %v295_v10, %v216_v4 }
  0xf6   : > { %v302_v13 = vcombine.low %v298_v11, %v299_v12 }
  0xf8   : > { %304 = vst [vmem:[%s204_s7] sm:$0xff] %v302_v13 }
  0xf9   : > { %533 = shalt.err (!%p530_p3)
}
  0xfa   : > { %s534_s23 = scalar_lea.hbm %s320_s11, 128  ;;  %s538_s30 = scalar_lea.hbm %s769_s3, 256 }
  0xfb   : > { %p535_p5 = scmp.ne.s32.totalorder %s320_s11, %s534_s23  ;;  %p539_p10 = scmp.lt.s32.totalorder %s320_s11, %s769_s3 }
  0xfc   : > { %p540_p4 = scmp.lt.s32.totalorder %s538_s30, %s534_s23 }
  0xfd   : > { %p536_p6 = pnand %p535_p5, %p677_p9 }
  0xfe   : > { %p541_p13 = por %p540_p4, %p539_p10 }
  0xff   : > { %p537_p7 = pneg %p536_p6 }
 0x101   : > { %p542_p8 = pnand %p541_p13, %p537_p7 }
 0x103   : > { %545 = shalt.err (!%p542_p8)
}
 0x104   : > { %428 = dma.vmem_to_hbm [thread:$0]  (%p677_p9), %s323_s8, 128, %s320_s11, %s306_s18  }
 0x105 PF: > { %s334_s6 = sand.u32 1, %s580_s12   ;;  %p775_p11 = scmp.ne.s32.totalorder %s773_s27, 0 }
 0x106   : > { %p776_p12 = scmp.ge.s32.totalorder %s600_s17, 2  ;;  %s335_s24 = scalar_lea.sflag [#allocation4], %s334_s6 }
 0x108   : > { %p435_p0 = pnand %p776_p12, %p775_p11 }
 0x10a   : > { %p436_p1 = pneg %p435_p0 }
 0x10c   : > { %575 = dma.done.wait (%p436_p1), %s335_s24, 128  }
 0x10d   : > { %577 = vsyncadd (%p436_p1), %s335_s24, 4294967168  ;;  %s19_s17 = sadd.s32 1, %s600_s17   ;;  %s777_s12 = smov %s584_s13 }
 0x10e   : > { %p16_p2 = scmp.ge.s32.totalorder %s19_s17, 4   ;;  %s778_s13 = smov %s588_s14 }
 0x10f   : > { %s779_s14 = smov %s682_s26  ;;  %s780_s15 = smov %s596_s16 }
 0x110   : > { %s781_s16 = smov %s783_s20  ;;  %18 = sbr.rel (!%p16_p2) target bundleno = 6 (0x6), region = 77 }
 0x115   :  { %340 = vsyncpa [#allocation3], 1 }
 0x116   :  { %342 = vsyncpa [#allocation3 + $0x1], 1 }
 0x117   :  { %343 = vsyncpa [#allocation4], 1 }
 0x118   :  { %345 = vsyncpa [#allocation4 + $0x1], 1 }

</bundles_post_ra>
